<compile_context>
chip_gen: v5e
topology: v5e:2x2
jax: 0.10.0
libtpu: 0.0.40
codegen_flags: <defaults>
</compile_context>

<pallas_src>
import functools

import jax
import jax.numpy as jnp
from jax.experimental import pallas as pl
from jax.experimental.pallas import tpu as pltpu


def _round_up(n, m):
    return ((n + m - 1) // m) * m


def _vmem_capacity_bytes():
    try:
        return int(pltpu.get_tpu_info().vmem_capacity_bytes)
    except Exception:
        return 64 << 20  # conservative (v7x per-TensorCore VMEM)


# --------------------------------------------------------------------------- #
# Kernels
# --------------------------------------------------------------------------- #
def _resident_kernel(hp, scale_ref, x_ref, wod_ref, bod_ref, wu_ref, bu_ref,
                     orig_ref, adap_ref):
    """All weights VMEM-resident; one fused x @ [W_orig | W_down] matmul."""
    x = x_ref[...]                                                    # (TM, Hp)
    both = jnp.dot(x, wod_ref[...],
                   preferred_element_type=jnp.float32) + bod_ref[...]
    orig_ref[...] = both[:, :hp].astype(orig_ref.dtype)              # orig path
    h = jnp.maximum(both[:, hp:], 0.0).astype(x.dtype)               # bf16 for MXU
    up = jnp.dot(h, wu_ref[...],
                 preferred_element_type=jnp.float32) + bu_ref[...]
    adap_ref[...] = (scale_ref[0] * up).astype(adap_ref.dtype)


def _col_tiled_kernel(scale_ref, x_ref, wo_ref, bo_ref, wd_ref, bd_ref,
                      wu_ref, bu_ref, orig_ref, adap_ref):
    """W_orig N-tiled (axis 1 of the grid); adapter computed only at j == 0."""
    x = x_ref[...]                                                    # (TM, Hp)
    orig = jnp.dot(x, wo_ref[...],
                   preferred_element_type=jnp.float32) + bo_ref[...]
    orig_ref[...] = orig.astype(orig_ref.dtype)

    @pl.when(pl.program_id(1) == 0)
    def _():
        h = jnp.dot(x, wd_ref[...],
                    preferred_element_type=jnp.float32) + bd_ref[...]
        h = jnp.maximum(h, 0.0).astype(x.dtype)
        up = jnp.dot(h, wu_ref[...],
                     preferred_element_type=jnp.float32) + bu_ref[...]
        adap_ref[...] = (scale_ref[0] * up).astype(adap_ref.dtype)


# --------------------------------------------------------------------------- #
# Builder: pad / cast weights once, return fwd(x, scale) -> (orig, adapter)
# --------------------------------------------------------------------------- #
def make_layer_adaptered(params, *, compute_dtype=jnp.bfloat16, out_dtype=None,
                         force_col_tiled=None, max_tn=512):
    w_orig, b_orig, w_down, b_down, w_up, b_up = params
    H = w_orig.shape[0]
    A = w_down.shape[1]
    Hp = _round_up(H, 128)              # lane-dense / MXU-aligned K & N
    Ap = _round_up(A, 128)
    out_dtype = compute_dtype if out_dtype is None else out_dtype
    cb = jnp.dtype(compute_dtype).itemsize
    ob = jnp.dtype(out_dtype).itemsize

    # --- one-time weight preprocessing (outside the per-call path) ---
    wo = jnp.pad(w_orig, ((0, Hp - H), (0, Hp - H))).astype(compute_dtype)
    bo = jnp.pad(b_orig, ((0, 0), (0, Hp - H))).astype(jnp.float32)
    wd = jnp.pad(w_down, ((0, Hp - H), (0, Ap - A))).astype(compute_dtype)
    bd = jnp.pad(b_down, ((0, 0), (0, Ap - A))).astype(jnp.float32)
    wu = jnp.pad(w_up, ((0, Ap - A), (0, Hp - H))).astype(compute_dtype)
    bu = jnp.pad(b_up, ((0, 0), (0, Hp - H))).astype(jnp.float32)
    wod = jnp.concatenate([wo, wd], axis=1)        # (Hp, Hp+Ap) shared-LHS fusion
    bod = jnp.concatenate([bo, bd], axis=1)        # (1,  Hp+Ap)

    vmem_cap = _vmem_capacity_bytes()
    budget = int(0.85 * vmem_cap)
    headroom = 2 << 20
    tm_target = 256 if vmem_cap <= (96 << 20) else 512
    weight_bytes = (Hp * (Hp + Ap) + Ap * Hp) * cb + (2 * Hp + Ap) * 4

    def resident_vmem(tm):
        xin = 2 * tm * Hp * cb                         # double-buffered x tiles
        outs = 2 * 2 * tm * Hp * ob                    # 2 outputs, double-buffered
        temps = tm * (Hp + Ap) * 4 + tm * Ap * cb + tm * Hp * 4   # f32 temps
        return weight_bytes + xin + outs + temps + headroom       # weights 1x-buffered

    def col_vmem(tm, tn):
        w = 2 * (Hp * tn * cb + tn * 4) + 2 * Hp * Ap * cb + (Ap + Hp) * 4
        xin = 2 * tm * Hp * cb
        outs = 2 * tm * tn * ob + 2 * tm * Hp * ob
        temps = tm * tn * 4 + tm * Ap * 4 + tm * Ap * cb + tm * Hp * 4
        return w + xin + outs + temps + headroom

    def forward(x, scale_factor):
        B, S, _ = x.shape
        M = B * S
        Mp = _round_up(M, 16)                 # bf16 packs 16 rows / sublane tile
        TM = min(tm_target, Mp)

        use_col = force_col_tiled
        if use_col is None:
            use_col = resident_vmem(TM) > budget
        if use_col:
            TN = min(max_tn, Hp)
            while Hp % TN:
                TN -= 128
            while TM > 16 and col_vmem(TM, TN) > budget:
                TM = _round_up(TM // 2, 16)
            vmem_needed = col_vmem(TM, TN)
        else:
            while TM > 16 and resident_vmem(TM) > budget:
                TM = _round_up(TM // 2, 16)
            vmem_needed = resident_vmem(TM)
        vmem_limit = int(min(max(vmem_needed, 16 << 20), 0.92 * vmem_cap))
        grid_m = pl.cdiv(Mp, TM)

        # Activations: zero-pad only the contraction dim (H) and <=15 rows.
        x2 = x.reshape(M, H)
        if Mp != M or Hp != H:
            x2 = jnp.pad(x2, ((0, Mp - M), (0, Hp - H)))
        x2 = x2.astype(compute_dtype)
        scale_arr = jnp.asarray(scale_factor, jnp.float32).reshape((1,))

        cost = pl.CostEstimate(
            flops=int(2 * Mp * Hp * (Hp + 2 * Ap)),
            transcendentals=0,
            bytes_accessed=int(Mp * Hp * cb + weight_bytes + 2 * Mp * Hp * ob))

        smem_spec = pl.BlockSpec(memory_space=pltpu.MemorySpace.SMEM)
        out_shapes = (jax.ShapeDtypeStruct((Mp, Hp), out_dtype),
                      jax.ShapeDtypeStruct((Mp, Hp), out_dtype))

        if not use_col:
            def const(shape):        # constant block -> single-buffered
                return pl.BlockSpec(shape, lambda i: (0, 0),
                                    pipeline_mode=pl.Buffered(1))
            row = lambda shape: pl.BlockSpec(shape, lambda i: (i, 0))
            orig2d, adap2d = pl.pallas_call(
                functools.partial(_resident_kernel, Hp),
                out_shape=out_shapes,
                grid=(grid_m,),
                in_specs=[
                    smem_spec,                # scale (traced SMEM scalar)
                    row((TM, Hp)),            # x tile (row pipelined)
                    const((Hp, Hp + Ap)),     # [W_orig | W_down]
                    const((1, Hp + Ap)),      # [b_orig | b_down]
                    const((Ap, Hp)),          # W_up
                    const((1, Hp)),           # b_up
                ],
                out_specs=(row((TM, Hp)), row((TM, Hp))),
                compiler_params=pltpu.CompilerParams(
                    dimension_semantics=("parallel",),
                    vmem_limit_bytes=vmem_limit),
                cost_estimate=cost,
            )(scale_arr, x2, wod, bod, wu, bu)
        else:
            grid_n = Hp // TN
            def const2(shape):
                return pl.BlockSpec(shape, lambda i, j: (0, 0),
                                    pipeline_mode=pl.Buffered(1))
            orig2d, adap2d = pl.pallas_call(
                _col_tiled_kernel,
                out_shape=out_shapes,
                grid=(grid_m, grid_n),
                in_specs=[
                    smem_spec,                                      # scale
                    pl.BlockSpec((TM, Hp), lambda i, j: (i, 0)),    # x tile
                    pl.BlockSpec((Hp, TN), lambda i, j: (0, j)),    # W_orig slab
                    pl.BlockSpec((1, TN), lambda i, j: (0, j)),     # b_orig slab
                    const2((Hp, Ap)),                               # W_down
                    const2((1, Ap)),                                # b_down
                    const2((Ap, Hp)),                               # W_up
                    const2((1, Hp)),                                # b_up
                ],
                out_specs=(
                    pl.BlockSpec((TM, TN), lambda i, j: (i, j)),    # orig
                    pl.BlockSpec((TM, Hp), lambda i, j: (i, 0)),    # adapter
                ),
                compiler_params=pltpu.CompilerParams(
                    dimension_semantics=("parallel", "arbitrary"),
                    vmem_limit_bytes=vmem_limit),
                cost_estimate=cost,
            )(scale_arr, x2, wo, bo, wd, bd, wu, bu)

        orig_out = orig2d[:M, :H].reshape(B, S, H)
        adap_out = adap2d[:M, :H].reshape(B, S, H)
        return orig_out, adap_out

    return forward


# --------------------------------------------------------------------------- #
# Params + self-test
# --------------------------------------------------------------------------- #
def init_params(key, hidden, adap_size):
    """Deterministic synthetic params (nn.Linear-style, stored [in, out])."""
    ks = jax.random.split(key, 6)

    def lin(kw, kb, fan_in, fan_out):
        bound = 1.0 / jnp.sqrt(fan_in)
        w = jax.random.uniform(kw, (fan_in, fan_out), jnp.float32, -bound, bound)
        b = jax.random.uniform(kb, (1, fan_out), jnp.float32, -bound, bound)
        return w, b

    w_orig, b_orig = lin(ks[0], ks[1], hidden, hidden)
    w_down, b_down = lin(ks[2], ks[3], hidden, adap_size)
    w_up, b_up = lin(ks[4], ks[5], adap_size, hidden)
    return (w_orig, b_orig, w_down, b_down, w_up, b_up)


def _reference(x, params, scale):
    """Mimics the kernel's bf16-operand / f32-accumulate math."""
    def bf(a):
        return a.astype(jnp.bfloat16).astype(jnp.float32)
    w_o, b_o, w_d, b_d, w_u, b_u = params
    ref_orig = bf(x) @ bf(w_o) + b_o[0]
    h = jnp.maximum(bf(x) @ bf(w_d) + b_d[0], 0.0)
    ref_adap = scale * (bf(h) @ bf(w_u) + b_u[0])
    return ref_orig, ref_adap


if __name__ == "__main__":
    key = jax.random.PRNGKey(0)
    kx1, kp1, kx2, kp2 = jax.random.split(key, 4)

    # --- test 1: small shape, resident-weight plan (auto-selected) ---
    B, S, H, ADAP_SIZE, SCALE = 2, 8, 32, 8, 2.0
    x1 = jax.random.normal(kx1, (B, S, H), jnp.float32)
    params1 = init_params(kp1, H, ADAP_SIZE)
    fwd1 = jax.jit(make_layer_adaptered(params1))
    orig1, adap1 = fwd1(x1, SCALE)
    jax.block_until_ready((orig1, adap1))
    ref_o1, ref_a1 = _reference(x1, params1, SCALE)
    assert jnp.allclose(orig1.astype(jnp.float32), ref_o1, atol=2e-2, rtol=2e-2), \
        "orig mismatch (resident)"
    assert jnp.allclose(adap1.astype(jnp.float32), ref_a1, atol=2e-2, rtol=2e-2), \
        "adapter mismatch (resident)"

    # --- test 2: force the N-tiled W_orig plan (grid_n = 2) ---
    H2, A2, SCALE2 = 256, 24, 0.5
    x2 = jax.random.normal(kx2, (2, 16, H2), jnp.float32)
    params2 = init_params(kp2, H2, A2)
    fwd2 = jax.jit(make_layer_adaptered(params2, force_col_tiled=True, max_tn=128))
    orig2, adap2 = fwd2(x2, SCALE2)
    jax.block_until_ready((orig2, adap2))
    ref_o2, ref_a2 = _reference(x2, params2, SCALE2)
    assert jnp.allclose(orig2.astype(jnp.float32), ref_o2, atol=2e-2, rtol=2e-2), \
        "orig mismatch (col-tiled)"
    assert jnp.allclose(adap2.astype(jnp.float32), ref_a2, atol=2e-2, rtol=2e-2), \
        "adapter mismatch (col-tiled)"

    print("KERNEL_OK")
</pallas_src>

<mosaic_0001>
module attributes {stable_mosaic.version = 11 : i64} {
  func.func @_resident_kernel(%arg0: i32, %arg1: memref<1xf32, #tpu.memory_space<smem>>, %arg2: memref<16x128xbf16, #tpu.memory_space<vmem>>, %arg3: memref<128x256xbf16, #tpu.memory_space<vmem>>, %arg4: memref<1x256xf32, #tpu.memory_space<vmem>>, %arg5: memref<128x128xbf16, #tpu.memory_space<vmem>>, %arg6: memref<1x128xf32, #tpu.memory_space<vmem>>, %arg7: memref<16x128xbf16, #tpu.memory_space<vmem>>, %arg8: memref<16x128xbf16, #tpu.memory_space<vmem>>) attributes {dimension_semantics = [#tpu.dimension_semantics<parallel>], iteration_bounds = array<i64: 1>, scalar_prefetch = 0 : i64, scratch_operands = 0 : i64, tpu.core_type = #tpu.core_type<tc>, window_params = [{transform_indices = @transform_0, window_bounds = array<i64: 1>}, {transform_indices = @transform_1, window_bounds = array<i64: 16, 128>}, {pipeline_mode = #tpu.pipeline_mode<synchronous>, transform_indices = @transform_2, window_bounds = array<i64: 128, 256>}, {pipeline_mode = #tpu.pipeline_mode<synchronous>, transform_indices = @transform_3, window_bounds = array<i64: 1, 256>}, {pipeline_mode = #tpu.pipeline_mode<synchronous>, transform_indices = @transform_4, window_bounds = array<i64: 128, 128>}, {pipeline_mode = #tpu.pipeline_mode<synchronous>, transform_indices = @transform_5, window_bounds = array<i64: 1, 128>}, {transform_indices = @transform_6, window_bounds = array<i64: 16, 128>}, {transform_indices = @transform_7, window_bounds = array<i64: 16, 128>}]} {
    %c0 = arith.constant 0 : index
    %c0_0 = arith.constant 0 : index
    %0 = vector.load %arg2[%c0, %c0_0] : memref<16x128xbf16, #tpu.memory_space<vmem>>, vector<16x128xbf16>
    %c0_1 = arith.constant 0 : index
    %c0_2 = arith.constant 0 : index
    %1 = vector.load %arg3[%c0_1, %c0_2] : memref<128x256xbf16, #tpu.memory_space<vmem>>, vector<128x256xbf16>
    %cst = arith.constant dense<0.000000e+00> : vector<16x256xf32>
    %2 = tpu.matmul %0, %1, %cst {dimension_numbers = #tpu.dot_dimension_numbers<[1], [0], [0], [1], [0, 0, 1, 1], [], []>} : vector<16x128xbf16>, vector<128x256xbf16>, vector<16x256xf32> -> vector<16x256xf32>
    %c0_3 = arith.constant 0 : index
    %c0_4 = arith.constant 0 : index
    %3 = vector.load %arg4[%c0_3, %c0_4] : memref<1x256xf32, #tpu.memory_space<vmem>>, vector<1x256xf32>
    %4 = vector.broadcast %3 : vector<1x256xf32> to vector<16x256xf32>
    %5 = arith.addf %2, %4 : vector<16x256xf32>
    %6 = vector.extract_strided_slice %5 {offsets = [0, 0], sizes = [16, 128], strides = [1, 1]} : vector<16x256xf32> to vector<16x128xf32>
    %7 = arith.truncf %6 : vector<16x128xf32> to vector<16x128xbf16>
    %c0_5 = arith.constant 0 : index
    %c0_6 = arith.constant 0 : index
    %8 = vector.load %arg7[%c0_5, %c0_6] : memref<16x128xbf16, #tpu.memory_space<vmem>>, vector<16x128xbf16>
    tpu.vector_store %arg7[%c0_5, %c0_6], %7 {strides = array<i32>} : memref<16x128xbf16, #tpu.memory_space<vmem>>, vector<16x128xbf16>,
    %9 = vector.extract_strided_slice %5 {offsets = [0, 128], sizes = [16, 128], strides = [1, 1]} : vector<16x256xf32> to vector<16x128xf32>
    %cst_7 = arith.constant 0.000000e+00 : f32
    %10 = vector.broadcast %cst_7 : f32 to vector<16x128xf32>
    %11 = arith.maximumf %9, %10 : vector<16x128xf32>
    %12 = arith.truncf %11 : vector<16x128xf32> to vector<16x128xbf16>
    %c0_8 = arith.constant 0 : index
    %c0_9 = arith.constant 0 : index
    %13 = vector.load %arg5[%c0_8, %c0_9] : memref<128x128xbf16, #tpu.memory_space<vmem>>, vector<128x128xbf16>
    %cst_10 = arith.constant dense<0.000000e+00> : vector<16x128xf32>
    %14 = tpu.matmul %12, %13, %cst_10 {dimension_numbers = #tpu.dot_dimension_numbers<[1], [0], [0], [1], [0, 0, 1, 1], [], []>} : vector<16x128xbf16>, vector<128x128xbf16>, vector<16x128xf32> -> vector<16x128xf32>
    %c0_11 = arith.constant 0 : index
    %c0_12 = arith.constant 0 : index
    %15 = vector.load %arg6[%c0_11, %c0_12] : memref<1x128xf32, #tpu.memory_space<vmem>>, vector<1x128xf32>
    %16 = vector.broadcast %15 : vector<1x128xf32> to vector<16x128xf32>
    %17 = arith.addf %14, %16 : vector<16x128xf32>
    %c0_13 = arith.constant 0 : index
    %18 = memref.load %arg1[%c0_13] : memref<1xf32, #tpu.memory_space<smem>>
    %19 = vector.broadcast %18 : f32 to vector<16x128xf32>
    %20 = arith.mulf %19, %17 : vector<16x128xf32>
    %21 = arith.truncf %20 : vector<16x128xf32> to vector<16x128xbf16>
    %c0_14 = arith.constant 0 : index
    %c0_15 = arith.constant 0 : index
    %22 = vector.load %arg8[%c0_14, %c0_15] : memref<16x128xbf16, #tpu.memory_space<vmem>>, vector<16x128xbf16>
    tpu.vector_store %arg8[%c0_14, %c0_15], %21 {strides = array<i32>} : memref<16x128xbf16, #tpu.memory_space<vmem>>, vector<16x128xbf16>,
    return
  }
  func.func @transform_0(%arg0: i32) -> i32 {
    %c0_i32 = arith.constant 0 : i32
    %c0_i32_0 = arith.constant 0 : i32
    return %c0_i32 : i32
  }
  func.func @transform_1(%arg0: i32) -> (i32, i32) {
    %c0_i32 = arith.constant 0 : i32
    %c0_i32_0 = arith.constant 0 : i32
    return %arg0, %c0_i32 : i32, i32
  }
  func.func @transform_2(%arg0: i32) -> (i32, i32) {
    %c0_i32 = arith.constant 0 : i32
    %c0_i32_0 = arith.constant 0 : i32
    %c0_i32_1 = arith.constant 0 : i32
    return %c0_i32, %c0_i32_0 : i32, i32
  }
  func.func @transform_3(%arg0: i32) -> (i32, i32) {
    %c0_i32 = arith.constant 0 : i32
    %c0_i32_0 = arith.constant 0 : i32
    %c0_i32_1 = arith.constant 0 : i32
    return %c0_i32, %c0_i32_0 : i32, i32
  }
  func.func @transform_4(%arg0: i32) -> (i32, i32) {
    %c0_i32 = arith.constant 0 : i32
    %c0_i32_0 = arith.constant 0 : i32
    %c0_i32_1 = arith.constant 0 : i32
    return %c0_i32, %c0_i32_0 : i32, i32
  }
  func.func @transform_5(%arg0: i32) -> (i32, i32) {
    %c0_i32 = arith.constant 0 : i32
    %c0_i32_0 = arith.constant 0 : i32
    %c0_i32_1 = arith.constant 0 : i32
    return %c0_i32, %c0_i32_0 : i32, i32
  }
  func.func @transform_6(%arg0: i32) -> (i32, i32) {
    %c0_i32 = arith.constant 0 : i32
    %c0_i32_0 = arith.constant 0 : i32
    return %arg0, %c0_i32 : i32, i32
  }
  func.func @transform_7(%arg0: i32) -> (i32, i32) {
    %c0_i32 = arith.constant 0 : i32
    %c0_i32_0 = arith.constant 0 : i32
    return %arg0, %c0_i32 : i32, i32
  }
}

</mosaic_0001>

<bundles_post_ra>
// kernel: forward.1
= control target key start
LH: loop header
LB: loop body
LE: loop exit
PB: predicated region body
PF: predicated region fallthrough
CT: control target
= control target key end

     0   :  { %14 = vsyncpa [#allocation4], 0  ;;  %s567_s0 = inlined_call_operand.<no memory space> [shape: f32[1], index: 0, kind: input, shape index: {}]   ;;  %s568_s1 = inlined_call_operand.vmem [shape: bf16[16,128], index: 1, kind: input, shape index: {}]   ;;  %s569_s2 = inlined_call_operand.hbm [shape: bf16[128,256], index: 2, kind: input, shape index: {}]   ;;  %s570_s3 = inlined_call_operand.vmem [shape: f32[1,256], index: 3, kind: input, shape index: {}]   ;;  %s571_s4 = inlined_call_operand.hbm [shape: bf16[128,128], index: 4, kind: input, shape index: {}]   ;;  %s572_s5 = inlined_call_operand.vmem [shape: f32[1,128], index: 5, kind: input, shape index: {}]   ;;  %s573_s6 = inlined_call_operand.vmem [shape: bf16[16,128], index: 6, kind: output, shape index: {0}]   ;;  %s574_s7 = inlined_call_operand.vmem [shape: bf16[16,128], index: 7, kind: output, shape index: {1}]  }
   0x1   :  { %s24_s26 = sshll.u32 %s569_s2, 4  ;;  %s25_s26 = int_to_ptr.hbm [resolvable:$true] %s24_s26 }
   0x2   :  { %15 = vsyncpa [#allocation6], 0  ;;  %s497_s27 = smov [#allocation3]   ;;  %s39_s8 = sshll.u32 %s571_s4, 4  ;;  %s40_s8 = int_to_ptr.hbm [resolvable:$true] %s39_s8 }
   0x3   :  { %s26_s28 = sshll.u32 %s497_s27, 4  ;;  %s498_s9 = smov 128   ;;  %s27_s28 = int_to_ptr.vmem [resolvable:$true] %s26_s28 }
   0x4   :  { %s499_s10 = smov 8   ;;  %s500_s11 = smov [#allocation5]  }
   0x5   :  { %32 = dma.hbm_to_vmem [thread:$0]  %s25_s26, 2048, %s27_s28, [#allocation4], %s498_s9, %s498_s9, %s499_s10  }
   0x6   :  { %s41_s12 = sshll.u32 %s500_s11, 4  ;;  %s501_s13 = smov 64   ;;  %s42_s12 = int_to_ptr.vmem [resolvable:$true] %s41_s12 }
   0x7   :  { %s502_s14 = smov 4  }
   0x8   :  { %47 = dma.hbm_to_vmem [thread:$0]  %s40_s8, 1024, %s42_s12, [#allocation6], %s501_s13, %s501_s13, %s502_s14  }
   0x9   :  { %493 = dma.done.wait [#allocation4], 2048  }
   0xa   :  { %494 = vsyncadd [#allocation4], 4294965248 }
   0xb   :  { %495 = dma.done.wait [#allocation6], 1024  }
   0xc   :  { %496 = vsyncadd [#allocation6], 4294966272  ;;  %v418_v0 = vld [vmem:[#allocation3 + $0x74] sm:$0xf]  ;;  %v367_v1 = vld [vmem:[#allocation3 + $0x78] sm:$0xf0] }
   0xd   :  { %v416_v2 = vld [vmem:[#allocation3 + $0x64] sm:$0xf]  ;;  %v370_v3 = vor.u32 %v418_v0, %v367_v1  ;;  %v359_v4 = vld [vmem:[#allocation3 + $0x68] sm:$0xf0]  ;;  %v414_v6 = vld [vmem:[#allocation3 + $0x54] sm:$0xf] }
   0xe   :  { %v362_v5 = vor.u32 %v416_v2, %v359_v4  ;;  %v351_v7 = vld [vmem:[#allocation3 + $0x58] sm:$0xf0]  ;;  %v365_v8 = vld [vmem:[#allocation3 + $0x70] sm:$0xf]  ;;  %v419_v9 = vld [vmem:[#allocation3 + $0x74] sm:$0xf0] }
   0xf   :  { %182 = vmatpush.bf16.msra.mxu1 %v370_v3  ;;  %v427_v10 = vld [vmem:[#allocation5 + $0x38] sm:$0xff]  ;;  %v357_v11 = vld [vmem:[#allocation3 + $0x60] sm:$0xf]  ;;  %v354_v12 = vor.u32 %v414_v6, %v351_v7  ;;  %v366_v13 = vor.u32 %v419_v9, %v365_v8  ;;  %v417_v14 = vld [vmem:[#allocation3 + $0x64] sm:$0xf0] }
  0x10   :  { %v412_v15 = vld [vmem:[#allocation3 + $0x44] sm:$0xf]  ;;  %v343_v16 = vld [vmem:[#allocation3 + $0x48] sm:$0xf0]  ;;  %271 = vmatpush.bf16.msra.mxu2 %v427_v10  ;;  %v426_v17 = vld [vmem:[#allocation5 + $0x30] sm:$0xff]  ;;  %v358_v18 = vor.u32 %v417_v14, %v357_v11  ;;  %v286_v11 = vstv %s567_s0 }
  0x11   :  { %168 = vmatpush.bf16.msra.mxu0 %v366_v13  ;;  %v349_v19 = vld [vmem:[#allocation3 + $0x50] sm:$0xf]  ;;  %v415_v20 = vld [vmem:[#allocation3 + $0x54] sm:$0xf0]  ;;  %v346_v21 = vor.u32 %v412_v15, %v343_v16  ;;  %v410_v22 = vld [vmem:[#allocation3 + $0x34] sm:$0xf] }
  0x12   :  { %v335_v23 = vld [vmem:[#allocation3 + $0x38] sm:$0xf0]  ;;  %v425_v24 = vld [vmem:[#allocation5 + $0x28] sm:$0xff]  ;;  %v350_v25 = vor.u32 %v415_v20, %v349_v19  ;;  %v341_v26 = vld [vmem:[#allocation3 + $0x40] sm:$0xf] }
  0x13   :  { %183 = vmatpush.bf16.msra.mxu1 %v362_v5  ;;  %v413_v27 = vld [vmem:[#allocation3 + $0x44] sm:$0xf0]  ;;  %v338_v28 = vor.u32 %v410_v22, %v335_v23  ;;  %v408_v29 = vld [vmem:[#allocation3 + $0x24] sm:$0xf]  ;;  %v327_v30 = vld [vmem:[#allocation3 + $0x28] sm:$0xf0] }
  0x14   :  { %272 = vmatpush.bf16.msra.mxu2 %v426_v17  ;;  %v424_v31 = vld [vmem:[#allocation5 + $0x20] sm:$0xff]  ;;  %v342_v32 = vor.u32 %v413_v27, %v341_v26  ;;  %v333_v33 = vld [vmem:[#allocation3 + $0x30] sm:$0xf]  ;;  %v411_v34 = vld [vmem:[#allocation3 + $0x34] sm:$0xf0]  ;;  %v330_v35 = vor.u32 %v408_v29, %v327_v30 }
  0x15   :  { %169 = vmatpush.bf16.msra.mxu0 %v358_v18  ;;  %v406_v36 = vld [vmem:[#allocation3 + $0x14] sm:$0xf]  ;;  %v319_v37 = vld [vmem:[#allocation3 + $0x18] sm:$0xf0]  ;;  %v334_v38 = vor.u32 %v411_v34, %v333_v33  ;;  %v404_v40 = vld [vmem:[#allocation3 + $0x4] sm:$0xf] }
  0x16   :  { %v322_v39 = vor.u32 %v406_v36, %v319_v37  ;;  %v311_v41 = vld [vmem:[#allocation3 + $0x8] sm:$0xf0]  ;;  %v403_v43 = vld [vmem:[%s568_s1] sm:$0xff]  ;;  %v423_v44 = vld [vmem:[#allocation5 + $0x18] sm:$0xff] }
  0x17   :  { %184 = vmatpush.bf16.msra.mxu1 %v354_v12  ;;  %v314_v42 = vor.u32 %v404_v40, %v311_v41  ;;  %v325_v45 = vld [vmem:[#allocation3 + $0x20] sm:$0xf]  ;;  %v409_v46 = vld [vmem:[#allocation3 + $0x24] sm:$0xf0]  ;;  %v422_v48 = vld [vmem:[#allocation5 + $0x10] sm:$0xff] }
  0x18   :  { %273 = vmatpush.bf16.msra.mxu2 %v425_v24  ;;  %v326_v47 = vor.u32 %v409_v46, %v325_v45  ;;  %v317_v49 = vld [vmem:[#allocation3 + $0x10] sm:$0xf]  ;;  %v407_v50 = vld [vmem:[#allocation3 + $0x14] sm:$0xf0]  ;;  %v421_v52 = vld [vmem:[#allocation5 + $0x8] sm:$0xff] }
  0x19   :  { %170 = vmatpush.bf16.msra.mxu0 %v350_v25  ;;  %v318_v51 = vor.u32 %v407_v50, %v317_v49  ;;  %v309_v53 = vld [vmem:[#allocation3] sm:$0xf]  ;;  %v405_v54 = vld [vmem:[#allocation3 + $0x4] sm:$0xf0] }
  0x1a   :  { %v310_v55 = vor.u32 %v405_v54, %v309_v53  ;;  %v420_v56 = vld [vmem:[#allocation5] sm:$0xff] }
  0x1b   :  { %185 = vmatpush.bf16.msra.mxu1 %v346_v21  ;;  %v76_v57 = vld [vmem:[%s570_s3] sm:$0x3] }
  0x1c   :  { %274 = vmatpush.bf16.msra.mxu2 %v424_v31  ;;  %v79_v59 = vperm.slane %v76_v57, 1  ;;  %v78_v3 = vperm.slane %v76_v57, 0  ;;  %v444_v9 = vld [vmem:[%s572_s5] ss:$0 sm:$0xff] }
  0x1d   :  { %171 = vmatpush.bf16.msra.mxu0 %v342_v32 }
  0x1f   :  { %186 = vmatpush.bf16.msra.mxu1 %v338_v28 }
  0x20   :  { %275 = vmatpush.bf16.msra.mxu2 %v423_v44 }
  0x21   :  { %172 = vmatpush.bf16.msra.mxu0 %v334_v38 }
  0x23   :  { %187 = vmatpush.bf16.msra.mxu1 %v330_v35 }
  0x24   :  { %276 = vmatpush.bf16.msra.mxu2 %v422_v48 }
  0x25   :  { %173 = vmatpush.bf16.msra.mxu0 %v326_v47 }
  0x27   :  { %188 = vmatpush.bf16.msra.mxu1 %v322_v39 }
  0x28   :  { %277 = vmatpush.bf16.msra.mxu2 %v421_v52 }
  0x29   :  { %174 = vmatpush.bf16.msra.mxu0 %v318_v51 }
  0x2b   :  { %189 = vmatpush.bf16.msra.mxu1 %v314_v42 }
  0x2c   :  { %278 = vmatpush.bf16.msra.mxu2 %v420_v56 }
  0x2d   :  { %175 = vmatpush.bf16.msra.mxu0 %v310_v55 }
  0x2e   :  { %190 = vmatmul.bf16.vlgmr.msra.gmra.mxu1 %v403_v43 }
  0x30   :  { %176 = vmatmul.bf16.vlgmr.msra.gmra.mxu0 %v403_v43 }
  0xab   :  { %v191_v58 = vpop.f32.mrf.mxu1 }
  0xac   :  { %v192_v60 = vadd.f32 %v191_v58, %v79_v59 }
  0xad   :  { %v177_v2 = vpop.f32.mrf.mxu0 }
  0xae   :  { %v200_v63 = vmax.f32 %v192_v60, 0.0  ;;  %v178_v4 = vadd.f32 %v177_v2, %v78_v3 }
  0xb3   :  { %v193_v61 = vpop.f32.mrf.mxu1 }
  0xb4   :  { %v194_v62 = vadd.f32 %v193_v61, %v79_v59 }
  0xb5   :  { %v179_v5 = vpop.f32.mrf.mxu0 }
  0xb6   :  { %v201_v0 = vmax.f32 %v194_v62, 0.0  ;;  %v180_v6 = vadd.f32 %v179_v5, %v78_v3 }
  0xb8   :  { %v202_v1 = vpack.c.bf16 %v201_v0, %v200_v63  ;;  %v431_v7 = vpack.c.bf16 %v180_v6, %v178_v4 }
  0xba   :  { %279 = vmatmul.bf16.vlgmr.msra.gmra.mxu2 %v202_v1  ;;  %432 = vst [vmem:[%s573_s6] sm:$0xff] %v431_v7  }
 0x13d   :  { %v280_v8 = vpop.f32.mrf.mxu2 }
 0x13e   :  { %v281_v10 = vadd.f32 %v444_v9, %v280_v8 }
 0x140   :  { %v287_v14 = vmul.f32 %v286_v11, %v281_v10 }
 0x145   :  { %v282_v12 = vpop.f32.mrf.mxu2 }
 0x146   :  { %v283_v13 = vadd.f32 %v444_v9, %v282_v12 }
 0x148   :  { %v288_v15 = vmul.f32 %v286_v11, %v283_v13 }
 0x14a   :  { %v436_v16 = vpack.c.bf16 %v288_v15, %v287_v14 }
 0x14c   :  { %437 = vst [vmem:[%s574_s7] sm:$0xff] %v436_v16  }
 0x14d   :  { %301 = vsyncpa [#allocation4], 1 }
 0x14e   :  { %302 = vsyncpa [#allocation6], 1 }

</bundles_post_ra>
